<compile_context>
chip_gen: v7x
topology: tpu7x:2x2x1
jax: 0.10.0
libtpu: 0.0.40
codegen_flags: <defaults>
</compile_context>

<pallas_src>
import jax
import jax.numpy as jnp
from jax.experimental import pallas as pl
from jax.experimental.pallas import tpu as pltpu


def _final_layer_kernel(x_ref, mod_ref, wl_ref, bl_ref, o_ref):
    # x_ref:   (1, tT, H)   input tile
    # mod_ref: (1, 2, H)    row 0 = shift, row 1 = (1 + scale)   [compute dtype]
    # wl_ref:  (H, O)       final linear weight                   [compute dtype]
    # bl_ref:  (1, O)       final linear bias                     [f32]
    # o_ref:   (1, tT, O)   output tile
    x32 = x_ref[0].astype(jnp.float32)                 # (tT, H) f32 for LN stats
    H = x32.shape[-1]
    inv_h = 1.0 / H

    # LayerNorm over hidden axis, no affine, eps = 1e-6 (single reduction pass).
    s1 = jnp.sum(x32, axis=-1, keepdims=True)           # (tT, 1)
    s2 = jnp.sum(x32 * x32, axis=-1, keepdims=True)      # (tT, 1)
    mean = s1 * inv_h
    var = jnp.maximum(s2 * inv_h - mean * mean, 0.0)      # clamp: cancellation guard
    inv_std = jax.lax.rsqrt(var + 1e-6)                   # (tT, 1) f32

    # Modulate chain in the compute dtype (bf16 on v6e/v7x -> halves VALU work).
    cdt = mod_ref.dtype
    m = mod_ref[0]                                        # (2, H)
    shift = m[0:1, :]                                     # (1, H)
    scale1p = m[1:2, :]                                   # (1, H) == 1 + scale

    xb = x_ref[0].astype(cdt)                             # (tT, H)
    y = (xb - mean.astype(cdt)) * inv_std.astype(cdt)     # normalized
    y = y * scale1p + shift                               # modulate

    # Final linear on the MXU, f32 accumulation; bias added in f32.
    out = jnp.dot(y, wl_ref[...], preferred_element_type=jnp.float32)
    out = out + bl_ref[...].astype(jnp.float32)
    o_ref[0] = out.astype(o_ref.dtype)


def final_layer_forward(x, c, w_ada, b_ada, w_lin, b_lin, *, t_tile=1024,
                        compute_dtype=jnp.bfloat16):
    """x: (B, T, H); c: (B, H); w_ada: (H, 2H); b_ada: (1, 2H);
       w_lin: (H, O); b_lin: (1, O).  Returns (B, T, O)."""
    B, T, H = x.shape
    O = w_lin.shape[1]
    out_dtype = x.dtype

    # ---- adaLN modulation hoisted out of the kernel (tiny matmul; XLA) ----
    ada = (jax.nn.silu(c.astype(jnp.float32)) @ w_ada.astype(jnp.float32)
           + b_ada.astype(jnp.float32))
    shift = ada[:, :H]
    scale1p = 1.0 + ada[:, H:]
    mod = jnp.stack([shift, scale1p], axis=1).astype(compute_dtype)   # (B, 2, H)

    w_lin_c = w_lin.astype(compute_dtype)
    b_lin_c = b_lin.astype(jnp.float32)

    # ---- T tiling: big tiles (amortize step overhead), multiple of 8 ----
    tT = min(t_tile, T)
    if tT != T:
        tT = max(8, 8 * (tT // 8))
    if B == 1 and T > 8:
        # keep >= 2 grid programs so both v7x TensorCores get work
        half = 8 * pl.cdiv(pl.cdiv(T, 2), 8)
        tT = min(tT, max(8, half))

    # ---- VMEM budget (double-buffered IO tiles + weights + temporaries) ----
    comp_sz = jnp.dtype(compute_dtype).itemsize
    x_sz = jnp.dtype(x.dtype).itemsize
    o_sz = jnp.dtype(out_dtype).itemsize

    def vmem_needed(tt):
        b = (2 * tt * H * x_sz          # x tiles (double buffered)
             + 2 * tt * O * o_sz        # out tiles (double buffered)
             + 2 * 2 * H * comp_sz      # mod (shift / 1+scale)
             + 2 * H * O * comp_sz      # W_lin (double buffered, constant map)
             + 2 * O * 4                # b_lin
             + 2 * tt * H * 4           # f32 x / x*x working set
             + 2 * tt * H * comp_sz     # normalize / modulate temporaries
             + tt * O * 4)              # f32 matmul result
        return int(b * 1.25) + (2 << 20)

    try:
        phys_vmem = pltpu.get_tpu_info().vmem_capacity_bytes
    except Exception:
        phys_vmem = 64 * 1024 * 1024    # conservative (v7x-sized) fallback
    vmem_cap = int(phys_vmem * 3 // 4)  # ~48 MiB on v7x, ~96 MiB on v5e/v6e

    while tT > 8 and vmem_needed(tT) > vmem_cap:
        tT = max(8, 8 * ((tT // 2) // 8))
    n_t = pl.cdiv(T, tT)
    vmem_limit = max(16 * 1024 * 1024, min(vmem_needed(tT), vmem_cap))

    return pl.pallas_call(
        _final_layer_kernel,
        out_shape=jax.ShapeDtypeStruct((B, T, O), out_dtype),
        grid_spec=pltpu.PrefetchScalarGridSpec(
            num_scalar_prefetch=0,
            grid=(B, n_t),
            in_specs=[
                pl.BlockSpec((1, tT, H), lambda b, t: (b, t, 0)),   # x tile
                pl.BlockSpec((1, 2, H), lambda b, t: (b, 0, 0)),    # shift / 1+scale
                pl.BlockSpec((H, O), lambda b, t: (0, 0)),          # W_lin (resident)
                pl.BlockSpec((1, O), lambda b, t: (0, 0)),          # b_lin (resident)
            ],
            out_specs=pl.BlockSpec((1, tT, O), lambda b, t: (b, t, 0)),
        ),
        compiler_params=pltpu.CompilerParams(
            dimension_semantics=("parallel", "parallel"),
            vmem_limit_bytes=vmem_limit),
    )(x, mod, w_lin_c, b_lin_c)


def _reference(x, c, w_ada, b_ada, w_lin, b_lin):
    """Pure-JAX f32 reference mirroring the PyTorch forward."""
    silu_c = c * jax.nn.sigmoid(c)
    ada = silu_c @ w_ada + b_ada[0]
    H = x.shape[-1]
    shift, scale = ada[:, :H], ada[:, H:]
    mean = jnp.mean(x, axis=-1, keepdims=True)
    var = jnp.mean((x - mean) ** 2, axis=-1, keepdims=True)
    x_norm = (x - mean) / jnp.sqrt(var + 1e-6)
    x_mod = x_norm * (1 + scale[:, None, :]) + shift[:, None, :]
    return x_mod @ w_lin + b_lin[0]


if __name__ == "__main__":
    # Small, module-consistent shapes.
    B, T, H = 2, 8, 32          # batch, tokens, hidden_size
    patch_size, out_channels = 2, 4
    O = patch_size * patch_size * out_channels  # 16

    key = jax.random.PRNGKey(0)
    kx, kc, kwa, kba, kwl, kbl = jax.random.split(key, 6)

    x = jax.random.normal(kx, (B, T, H), dtype=jnp.float32)
    c = jax.random.normal(kc, (B, H), dtype=jnp.float32)

    # PyTorch Linear weights stored transposed as (in, out).
    w_ada = jax.random.normal(kwa, (H, 2 * H), dtype=jnp.float32) * 0.02
    b_ada = jax.random.normal(kba, (1, 2 * H), dtype=jnp.float32) * 0.02
    w_lin = jax.random.normal(kwl, (H, O), dtype=jnp.float32) * 0.02
    b_lin = jax.random.normal(kbl, (1, O), dtype=jnp.float32) * 0.02

    ref = _reference(x, c, w_ada, b_ada, w_lin, b_lin)

    # f32 compute path: must match the reference tightly.
    out_f32 = final_layer_forward(x, c, w_ada, b_ada, w_lin, b_lin,
                                  compute_dtype=jnp.float32)
    out_f32 = jax.block_until_ready(out_f32)
    assert out_f32.shape == (B, T, O), out_f32.shape
    assert jnp.allclose(out_f32, ref, atol=1e-4, rtol=1e-4), (
        float(jnp.max(jnp.abs(out_f32 - ref))))

    # Default (bf16 modulate + matmul) path: relaxed tolerance for bf16 rounding.
    out_bf16 = final_layer_forward(x, c, w_ada, b_ada, w_lin, b_lin)
    out_bf16 = jax.block_until_ready(out_bf16)
    assert out_bf16.shape == (B, T, O), out_bf16.shape
    assert jnp.allclose(out_bf16, ref, atol=3e-2, rtol=3e-2), (
        float(jnp.max(jnp.abs(out_bf16 - ref))))

    print("KERNEL_OK")
</pallas_src>

<mosaic_0001>
module attributes {stable_mosaic.version = 11 : i64} {
  func.func @_final_layer_kernel(%arg0: i32, %arg1: i32, %arg2: memref<1x8x32xf32, #tpu.memory_space<vmem>>, %arg3: memref<1x2x32xf32, #tpu.memory_space<vmem>>, %arg4: memref<32x16xf32, #tpu.memory_space<vmem>>, %arg5: memref<1x16xf32, #tpu.memory_space<vmem>>, %arg6: memref<1x8x16xf32, #tpu.memory_space<vmem>>) attributes {dimension_semantics = [#tpu.dimension_semantics<parallel>, #tpu.dimension_semantics<parallel>], iteration_bounds = array<i64: 2, 1>, scalar_prefetch = 0 : i64, scratch_operands = 0 : i64, tpu.core_type = #tpu.core_type<tc>, window_params = [{transform_indices = @transform_0, window_bounds = array<i64: 1, 8, 32>}, {transform_indices = @transform_1, window_bounds = array<i64: 1, 2, 32>}, {pipeline_mode = #tpu.pipeline_mode<synchronous>, transform_indices = @transform_2, window_bounds = array<i64: 32, 16>}, {pipeline_mode = #tpu.pipeline_mode<synchronous>, transform_indices = @transform_3, window_bounds = array<i64: 1, 16>}, {transform_indices = @transform_4, window_bounds = array<i64: 1, 8, 16>}]} {
    %c0 = arith.constant 0 : index
    %c0_0 = arith.constant 0 : index
    %c0_1 = arith.constant 0 : index
    %0 = vector.load %arg2[%c0, %c0_0, %c0_1] : memref<1x8x32xf32, #tpu.memory_space<vmem>>, vector<1x8x32xf32>
    %1 = vector.shape_cast %0 : vector<1x8x32xf32> to vector<8x32xf32>
    %cst = arith.constant dense<0.000000e+00> : vector<8xf32>
    %2 = vector.multi_reduction <add>, %1, %cst [1] : vector<8x32xf32> to vector<8xf32>
    %3 = vector.shape_cast %2 : vector<8xf32> to vector<8x1xf32>
    %4 = arith.mulf %1, %1 : vector<8x32xf32>
    %cst_2 = arith.constant dense<0.000000e+00> : vector<8xf32>
    %5 = vector.multi_reduction <add>, %4, %cst_2 [1] : vector<8x32xf32> to vector<8xf32>
    %6 = vector.shape_cast %5 : vector<8xf32> to vector<8x1xf32>
    %cst_3 = arith.constant 3.125000e-02 : f32
    %7 = vector.broadcast %cst_3 : f32 to vector<8x1xf32>
    %8 = arith.mulf %3, %7 : vector<8x1xf32>
    %cst_4 = arith.constant 3.125000e-02 : f32
    %9 = vector.broadcast %cst_4 : f32 to vector<8x1xf32>
    %10 = arith.mulf %6, %9 : vector<8x1xf32>
    %11 = arith.mulf %8, %8 : vector<8x1xf32>
    %12 = arith.subf %10, %11 : vector<8x1xf32>
    %cst_5 = arith.constant 0.000000e+00 : f32
    %13 = vector.broadcast %cst_5 : f32 to vector<8x1xf32>
    %14 = arith.maximumf %12, %13 : vector<8x1xf32>
    %cst_6 = arith.constant 9.99999997E-7 : f32
    %15 = vector.broadcast %cst_6 : f32 to vector<8x1xf32>
    %16 = arith.addf %14, %15 : vector<8x1xf32>
    %17 = math.rsqrt %16 : vector<8x1xf32>
    %c0_7 = arith.constant 0 : index
    %c0_8 = arith.constant 0 : index
    %c0_9 = arith.constant 0 : index
    %18 = vector.load %arg3[%c0_7, %c0_8, %c0_9] : memref<1x2x32xf32, #tpu.memory_space<vmem>>, vector<1x2x32xf32>
    %19 = vector.shape_cast %18 : vector<1x2x32xf32> to vector<2x32xf32>
    %20 = vector.extract_strided_slice %19 {offsets = [0, 0], sizes = [1, 32], strides = [1, 1]} : vector<2x32xf32> to vector<1x32xf32>
    %21 = vector.extract_strided_slice %19 {offsets = [1, 0], sizes = [1, 32], strides = [1, 1]} : vector<2x32xf32> to vector<1x32xf32>
    %c0_10 = arith.constant 0 : index
    %c0_11 = arith.constant 0 : index
    %c0_12 = arith.constant 0 : index
    %22 = vector.load %arg2[%c0_10, %c0_11, %c0_12] : memref<1x8x32xf32, #tpu.memory_space<vmem>>, vector<1x8x32xf32>
    %23 = vector.shape_cast %22 : vector<1x8x32xf32> to vector<8x32xf32>
    %24 = vector.broadcast %8 : vector<8x1xf32> to vector<8x32xf32>
    %25 = arith.subf %23, %24 : vector<8x32xf32>
    %26 = vector.broadcast %17 : vector<8x1xf32> to vector<8x32xf32>
    %27 = arith.mulf %25, %26 : vector<8x32xf32>
    %28 = vector.broadcast %21 : vector<1x32xf32> to vector<8x32xf32>
    %29 = arith.mulf %27, %28 : vector<8x32xf32>
    %30 = vector.broadcast %20 : vector<1x32xf32> to vector<8x32xf32>
    %31 = arith.addf %29, %30 : vector<8x32xf32>
    %c0_13 = arith.constant 0 : index
    %c0_14 = arith.constant 0 : index
    %32 = vector.load %arg4[%c0_13, %c0_14] : memref<32x16xf32, #tpu.memory_space<vmem>>, vector<32x16xf32>
    %cst_15 = arith.constant dense<0.000000e+00> : vector<8x16xf32>
    %33 = tpu.matmul %31, %32, %cst_15 {dimension_numbers = #tpu.dot_dimension_numbers<[1], [0], [0], [1], [0, 0, 1, 1], [], []>} : vector<8x32xf32>, vector<32x16xf32>, vector<8x16xf32> -> vector<8x16xf32>
    %c0_16 = arith.constant 0 : index
    %c0_17 = arith.constant 0 : index
    %34 = vector.load %arg5[%c0_16, %c0_17] : memref<1x16xf32, #tpu.memory_space<vmem>>, vector<1x16xf32>
    %35 = vector.broadcast %34 : vector<1x16xf32> to vector<8x16xf32>
    %36 = arith.addf %33, %35 : vector<8x16xf32>
    %c0_18 = arith.constant 0 : index
    %c0_19 = arith.constant 0 : index
    %c0_20 = arith.constant 0 : index
    %37 = vector.load %arg6[%c0_18, %c0_19, %c0_20] : memref<1x8x16xf32, #tpu.memory_space<vmem>>, vector<1x8x16xf32>
    %38 = vector.shape_cast %37 : vector<1x8x16xf32> to vector<8x16xf32>
    %39 = vector.shape_cast %36 : vector<8x16xf32> to vector<1x8x16xf32>
    tpu.vector_store %arg6[%c0_18, %c0_19, %c0_20], %39 {strides = array<i32>} : memref<1x8x16xf32, #tpu.memory_space<vmem>>, vector<1x8x16xf32>,
    return
  }
  func.func @transform_0(%arg0: i32, %arg1: i32) -> (i32, i32, i32) {
    %c0_i32 = arith.constant 0 : i32
    %c0_i32_0 = arith.constant 0 : i32
    return %arg0, %arg1, %c0_i32 : i32, i32, i32
  }
  func.func @transform_1(%arg0: i32, %arg1: i32) -> (i32, i32, i32) {
    %c0_i32 = arith.constant 0 : i32
    %c0_i32_0 = arith.constant 0 : i32
    %c0_i32_1 = arith.constant 0 : i32
    return %arg0, %c0_i32, %c0_i32_0 : i32, i32, i32
  }
  func.func @transform_2(%arg0: i32, %arg1: i32) -> (i32, i32) {
    %c0_i32 = arith.constant 0 : i32
    %c0_i32_0 = arith.constant 0 : i32
    %c0_i32_1 = arith.constant 0 : i32
    return %c0_i32, %c0_i32_0 : i32, i32
  }
  func.func @transform_3(%arg0: i32, %arg1: i32) -> (i32, i32) {
    %c0_i32 = arith.constant 0 : i32
    %c0_i32_0 = arith.constant 0 : i32
    %c0_i32_1 = arith.constant 0 : i32
    return %c0_i32, %c0_i32_0 : i32, i32
  }
  func.func @transform_4(%arg0: i32, %arg1: i32) -> (i32, i32, i32) {
    %c0_i32 = arith.constant 0 : i32
    %c0_i32_0 = arith.constant 0 : i32
    return %arg0, %arg1, %c0_i32 : i32, i32, i32
  }
}

</mosaic_0001>

<bundles_post_ra>
// kernel: tpu_custom_call.1
= control target key start
LH: loop header
LB: loop body
LE: loop exit
PB: predicated region body
PF: predicated region fallthrough
CT: control target
= control target key end

     0   :  { %9 = vsyncpa [#allocation3], 0  ;;  %s790_s0 = inlined_call_operand.vmem [shape: f32[2,8,32], index: 0, kind: input, shape index: {}]   ;;  %s791_s1 = inlined_call_operand.vmem [shape: f32[2,2,32], index: 1, kind: input, shape index: {}]   ;;  %s792_s2 = inlined_call_operand.vmem [shape: f32[32,16], index: 2, kind: input, shape index: {}]   ;;  %s793_s3 = inlined_call_operand.vmem [shape: f32[1,16], index: 3, kind: input, shape index: {}]   ;;  %s794_s4 = inlined_call_operand.hbm [shape: f32[2,8,16], index: 4, kind: output, shape index: {}]  }
   0x1   :  { %11 = vsyncpa [#allocation3 + $0x1], 0  ;;  %s653_s15 = smov 0   ;;  %s655_s16 = smov 0  }
   0x2   :  { %s657_s17 = smov 0   ;;  %s659_s18 = smov 0  }
   0x3   :  { %s661_s19 = smov 0   ;;  %s663_s20 = smov 0  }
   0x4 LB: > { %s448_s21 = sadd.s32 4294967295, %s622_s20   ;;  %s449_s22 = sadd.s32 4294967294, %s622_s20   ;;  %s622_s20 = sphi %s663_s20, %s17_s20   ;;  %s618_s19 = sphi %s661_s19, %s801_s19   ;;  %s614_s18 = sphi %s659_s18, %s800_s18   ;;  %s610_s17 = sphi %s657_s17, %s799_s17   ;;  %s606_s16 = sphi %s655_s16, %s798_s16   ;;  %s602_s15 = sphi %s653_s15, %s797_s15  }
   0x5   : > { %s29_s23 = sadd.s32 1, %s618_s19  ;;  %s134_s24 = sadd.s32 1, %s610_s17 }
   0x6   : > { %p31_p0 = scmp.ge.s32.totalorder %s29_s23, 2  ;;  %p144_p1 = scmp.ne.s32.totalorder %s610_s17, %s606_s16 }
   0x7   : > { %p145_p2 = scmp.eq.s32.totalorder %s448_s21, 1  ;;  %p150_p3 = scmp.ne.s32.totalorder %s606_s16, %s602_s15 }
   0x8   : > { %s803_s23 = smov (%p31_p0, %s29_s23), 0  ;;  %p151_p5 = scmp.eq.s32.totalorder %s449_s22, 1 }
   0x9   : > { %p693_p4 = por %p145_p2, %p144_p1  ;;  %s129_s26 = ssub.s32 %s618_s19, %s803_s23 }
   0xa   : > { %p452_p6 = scmp.ge.s32.totalorder %s622_s20, 1  ;;  %p132_p7 = scmp.eq.s32.totalorder %s129_s26, 0 }
   0xb   : > { %p700_p8 = por %p151_p5, %p150_p3  ;;  %p192_p9 = scmp.lt.s32.totalorder %s622_s20, 3 }
   0xc   : > { %s706_s28 = scalar_select %p132_p7, %s610_s17, %s134_s24  }
   0xd   : > { %p193_p10 = pnand %p452_p6, %p192_p9 }
   0xe   : > { %p224_p11 = scmp.lt.s32.totalorder (!%p193_p10), %s614_s18, 1  ;;  %vm236_vm0 = vcmask (!%p193_p10), 261120   ;;  %v264_v4 = vld [vmem:[%s792_s2] sm:$0xff] (!%p193_p10)  ;;  %v265_v5 = vld [vmem:[%s792_s2 + $0x8] sm:$0xff] (!%p193_p10)  ;;  %v266_v6 = vld [vmem:[%s792_s2 + $0x10] sm:$0xff] (!%p193_p10)  ;;  %v624_v7 = vmov (!%p193_p10), 0.0|0.0   ;;  %v254_v19 = vlaneseq (!%p193_p10) }
   0xf   : > { %196 = sbr.rel (%p193_p10) target bundleno = 427 (0x1ab), region = 36  ;;  %478 = vmatprep.subr.bf16.mxu0 (!%p193_p10), %v624_v7  ;;  %v479_v8 = vpack.c.bf16 (!%p193_p10), %v265_v5, %v264_v4  ;;  %v267_v9 = vld [vmem:[%s792_s2 + $0x18] sm:$0xff] (!%p193_p10)  ;;  %vm625_vm1 = vmmov (!%p193_p10), 0   ;;  %v626_v10 = vmov (!%p193_p10), 0.0   ;;  %v456_v32 = vld [vmem:[%s793_s3] ss:$0 sm:$0xff] (!%p193_p10) }
  0x10   : > { %475 = vmatprep.mubr.msk.f32.mxu0 (!%p193_p10), %vm625_vm1, %v626_v10  ;;  %v482_v11 = vpack.c.bf16 (!%p193_p10), %v267_v9, %v266_v6  ;;  %v255_v21 = vshrl.u32 (!%p193_p10), %v254_v19, 7  ;;  %s459_s8 = sshll.u32 (!%p193_p10), %s614_s18, 7  ;;  %vm348_vm2 = vcmask (!%p193_p10), 130048  }
  0x11   : > { %480 = vmatpush3.bf16.msra.mxu0 (!%p193_p10), %v479_v8  ;;  %s743_s13 = scalar_lea.hbm (!%p193_p10), %s794_s4, %s459_s8 }
  0x12   : > { %481 = vmatprep.subr.bf16.mxu0 (!%p193_p10), %v624_v7  ;;  %v256_v22 = vsub.s32 (!%p193_p10), 1, %v255_v21  ;;  %v261_v24 = vsub.s32 (!%p193_p10), 0, %v255_v21 }
  0x15   : > { %483 = vmatpush3.bf16.msra.mxu0 (!%p193_p10), %v482_v11 }
  0x16   : > { %s710_s29 = scalar_select %p224_p11, %s614_s18, 1 }
  0x17   : > { %s627_s18 = smov [#allocation2]  }
  0x18   : > { %s454_s30 = sshll.u32 %s710_s29, 3  ;;  %s455_s22 = sshll.u32 %s710_s29, 1 }
  0x19   : > { %s230_s7 = scalar_lea.vmem %s790_s0, %s454_s30  ;;  %s234_s30 = scalar_lea.vmem %s791_s1, %s455_s22 }
  0x1a   : > { %v235_v0 = vld [vmem:[%s230_s7] sm:$0xff]  ;;  %s221_s29 = sand.u32 1, %s606_s16   ;;  %s548_s22 = sshll.u32 %s627_s18, 4  ;;  %s549_s22 = int_to_ptr.vmem [resolvable:$false] %s548_s22 }
  0x1b   : > { %v237_v1 = vsel %vm236_vm0, %v235_v0, 0.0  ;;  %v240_v2 = vmul.f32 %v235_v0, %v235_v0  ;;  %v251_v23 = vld [vmem:[%s234_s30] sm:$0x3]  ;;  %s453_s5 = sshll.u32 %s221_s29, 3  ;;  %s351_s14 = scalar_lea.sflag [#allocation3], %s221_s29 }
  0x1c   : > { %238 = vadd.xlane.f32.xlu0 %v237_v1  ;;  %v257_v25 = vrot.slane %v251_v23, %v256_v22  ;;  %v262_v28 = vrot.slane %v251_v23, %v261_v24  ;;  %s223_s9 = scalar_lea.vmem [#allocation2], %s453_s5  ;;  %s550_s24 = scalar_lea.vmem %s549_s22, 256 }
  0x1d   : > { %v241_v3 = vsel %vm236_vm0, %v240_v2, 0.0  ;;  %s365_s10 = sshll.u32 %s223_s9, 4  ;;  %s745_s10 = int_to_ptr.vmem [resolvable:$true] %s365_s10 }
  0x1e   : > { %s544_s21 = scalar_lea.vmem %s745_s10, 128  ;;  %p551_p1 = scmp.lt.s32.totalorder %s745_s10, %s549_s22 }
  0x1f   : > { %p545_p12 = scmp.ne.s32.totalorder %s745_s10, %s544_s21  ;;  %p552_p2 = scmp.lt.s32.totalorder %s550_s24, %s544_s21 }
  0x20   : > { %242 = vadd.xlane.f32.xlu0 %v241_v3 }
  0x21   : > { %p546_p13 = pnand %p545_p12, %p693_p4  ;;  %p553_p3 = por %p552_p2, %p551_p1 }
  0x23   : > { %p547_p0 = pneg %p546_p13 }
  0x25   : > { %p554_p5 = pnand %p553_p3, %p547_p0 }
  0xa9   : > { %v239_v12 = vpop.xlane.xlu0 %238 }
  0xaa   : > { %v244_v13 = vmul.f32 0.03125, %v239_v12 }
  0xac   : > { %v246_v15 = vmul.f32 %v244_v13, %v244_v13  ;;  %v252_v26 = vsub.f32 %v235_v0, %v244_v13 }
  0xad   : > { %v243_v14 = vpop.xlane.xlu0 %242 }
  0xae   : > { %v245_v16 = vmul.f32 0.03125, %v243_v14 }
  0xb0   : > { %v247_v17 = vsub.f32 %v245_v16, %v246_v15 }
  0xb2   : > { %v248_v18 = vmax.f32 %v247_v17, 0.0 }
  0xb4   : > { %v249_v20 = vadd.f32 1e-06, %v248_v18 }
  0xb6   : > { %542 = vrsqrt.f32 %v249_v20 }
  0xc0   : > { %v543_v27 = vpop.eup %542 }
  0xc1   : > { %v253_v29 = vmul.f32 %v543_v27, %v252_v26 }
  0xc3   : > { %v258_v30 = vmul.f32 %v257_v25, %v253_v29 }
  0xc5   : > { %v263_v31 = vadd.f32 %v262_v28, %v258_v30 }
  0xc7   : > { %476 = vmatmul.mubr.msk.f32.vlgmr.msra.gmra.mrb[0].mxu0 %vm236_vm0, %v263_v31 }
 0x19a   : > { %v344_v33 = vpop.f32.mrb[0].mxu0 }
 0x19b   : > { %v345_v34 = vadd.f32 %v456_v32, %v344_v33  ;;  %v477_v35 = vpop.f32.mrb[1].mxu0 }
 0x19d   : > { %349 = vst.msk [vmem:[%s223_s9] sm:$0xff] %vm348_vm2, %v345_v34 }
 0x19e   : > { %557 = shalt.err (!%p554_p5)
}
 0x19f   : > { %s558_s26 = scalar_lea.hbm %s743_s13, 128  ;;  %s562_s5 = scalar_lea.hbm %s794_s4, 256 }
 0x1a0   : > { %p559_p6 = scmp.ne.s32.totalorder %s743_s13, %s558_s26  ;;  %p563_p10 = scmp.lt.u32.totalorder %s743_s13, %s794_s4 }
 0x1a1   : > { %p564_p11 = scmp.lt.u32.totalorder %s562_s5, %s558_s26  ;;  %p566_p13 = scmp.lt.u32.totalorder %s558_s26, %s743_s13 }
 0x1a2   : > { %p560_p7 = pnand %p559_p6, %p693_p4 }
 0x1a3   : > { %p565_p12 = por %p564_p11, %p563_p10 }
 0x1a4   : > { %p561_p9 = pneg %p560_p7 }
 0x1a5   : > { %p567_p0 = por %p566_p13, %p565_p12 }
 0x1a7   : > { %p568_p1 = pnand %p567_p0, %p561_p9 }
 0x1a9   : > { %571 = shalt.err (!%p568_p1)
}
 0x1aa   : > { %484 = dma.vmem_to_hbm [thread:$0]  (%p693_p4), %s745_s10, 128, %s743_s13, %s351_s14  }
 0x1ab PF: > { %p490_p2 = scmp.ge.s32.totalorder %s622_s20, 2  ;;  %s377_s8 = sand.u32 1, %s602_s15  }
 0x1ac   : > { %s378_s9 = scalar_lea.sflag [#allocation3], %s377_s8 }
 0x1ad   : > { %p487_p3 = pnand %p490_p2, %p700_p8 }
 0x1af   : > { %597 = dma.done.wait (!%p487_p3), %s378_s9, 128  }
 0x1b0   : > { %599 = vsyncadd (!%p487_p3), %s378_s9, 4294967168  ;;  %s17_s20 = sadd.s32 1, %s622_s20   ;;  %s797_s15 = smov %s606_s16 }
 0x1b1   : > { %p14_p5 = scmp.ge.s32.totalorder %s17_s20, 4   ;;  %s798_s16 = smov %s610_s17 }
 0x1b2   : > { %s799_s17 = smov %s706_s28  ;;  %s800_s18 = smov %s618_s19 }
 0x1b3   : > { %s801_s19 = smov %s803_s23  ;;  %16 = sbr.rel (!%p14_p5) target bundleno = 4 (0x4), region = 74 }
 0x1ba   :  { %383 = vsyncpa [#allocation3], 1 }
 0x1bb   :  { %385 = vsyncpa [#allocation3 + $0x1], 1 }

</bundles_post_ra>
